<compile_context>
chip_gen: v6e
topology: v6e:2x2x1
jax: 0.10.0
libtpu: 0.0.40
codegen_flags: <defaults>
</compile_context>

<pallas_src>
import functools

import jax
import jax.numpy as jnp
from jax.experimental import pallas as pl
from jax.experimental.pallas import tpu as pltpu


def _round_up(x, m):
    return ((x + m - 1) // m) * m


def logreg_kernel(x_ref, w_ref, b_ref, o_ref, *, num_k, tk, w_resident):
    # x_ref: (TB, TK) | w_ref: (K, N_PAD) resident OR (TK, N_PAD) streamed
    # b_ref: (1, N_PAD) | o_ref: (TB, N_PAD) f32, resident across the K grid axis.
    if num_k == 1:
        o_ref[...] = (
            jnp.dot(x_ref[...], w_ref[...], preferred_element_type=jnp.float32)
            + b_ref[...]
        )
    else:
        k = pl.program_id(1)

        @pl.when(k == 0)
        def _init():
            # Seed the resident output block with the bias: no scratch accumulator,
            # no separate finalize copy.
            o_ref[...] = jnp.broadcast_to(b_ref[...], o_ref.shape)

        if w_resident:
            start = pl.multiple_of(k * tk, 128)     # tk is a multiple of 128 here
            w = w_ref[pl.ds(start, tk), :]
        else:
            w = w_ref[...]
        o_ref[...] += jnp.dot(x_ref[...], w, preferred_element_type=jnp.float32)


def init_logreg_params(key, ft_in, nb_classes):
    """Matches PyTorch: xavier_uniform_ on weight [nb_classes, ft_in]; bias = 0."""
    bound = (6.0 / (ft_in + nb_classes)) ** 0.5
    weight = jax.random.uniform(
        key, (nb_classes, ft_in), dtype=jnp.float32, minval=-bound, maxval=bound
    )
    bias = jnp.zeros((nb_classes,), dtype=jnp.float32)
    return weight, bias


def prepare_logreg_params(weight, bias):
    """One-time prep (hoisted out of the forward path): transpose weight to
    [ft_in, n_pad] and zero-pad the class axis to a multiple of 128 so the kernel's
    output stores are lane-dense (unmasked vst). No K-padding is ever needed."""
    nb_classes, ft_in = weight.shape
    n_pad = int(_round_up(max(nb_classes, 128), 128))
    w_t = jnp.zeros((ft_in, n_pad), weight.dtype).at[:, :nb_classes].set(weight.T)
    b2 = jnp.zeros((1, n_pad), bias.dtype).at[0, :nb_classes].set(bias)
    return w_t, b2


@functools.partial(jax.jit, static_argnames=("nb_classes", "tb_target", "tk_target"))
def logreg_forward(seq, w_t, b2, nb_classes, *, tb_target=1024, tk_target=4096):
    """seq: [B, ft_in] f32; w_t: [ft_in, n_pad] (pre-transposed/lane-padded);
    b2: [1, n_pad]. Returns logits [B, nb_classes] in f32."""
    B, ft_in = seq.shape
    k_w, n_pad = w_t.shape
    assert k_w == ft_in

    # ---- batch tiling: balanced tiles, no activation padding, >=2 tiles whenever
    # possible so the "parallel" axis shards across both v7x TensorCores ----
    n_bt_min = 2 if B >= 16 else 1
    n_bt = max(pl.cdiv(B, tb_target), n_bt_min)
    tb = min(_round_up(pl.cdiv(B, n_bt), 8), _round_up(B, 8))
    grid_b = pl.cdiv(B, tb)            # edge-block rows past B are garbage, sliced off

    # ---- feature tiling: never pad x along K per call; either a single K step or a
    # multiple-of-128 divisor of ft_in ----
    if ft_in <= tk_target or ft_in % 128 != 0:
        # TODO(synk): enormous ft_in that is not a multiple of 128 falls back to a
        # single (possibly large) K step; pad W/x once at prep time if that ever bites.
        tk, num_k = ft_in, 1
    else:
        tk = 128
        for cand in range(tk_target - tk_target % 128, 127, -128):
            if ft_in % cand == 0:
                tk = cand
                break
        num_k = ft_in // tk

    # ---- W residency: constant index_map => DMA'd exactly once across all batch
    # tiles and K steps; only stream K tiles of W if it is huge ----
    w_bytes = ft_in * n_pad * w_t.dtype.itemsize
    w_resident = (num_k == 1) or (w_bytes <= (16 << 20))
    if w_resident:
        w_spec = pl.BlockSpec((ft_in, n_pad), lambda i, k: (0, 0))
        w_block_bytes = w_bytes
    else:
        w_spec = pl.BlockSpec((tk, n_pad), lambda i, k: (k, 0))
        w_block_bytes = tk * n_pad * w_t.dtype.itemsize

    itemsize = seq.dtype.itemsize
    # Double-buffered x/out/W tiles + bias + headroom (W/bias have constant index maps
    # so they are only fetched once, but their second pipeline buffer still exists).
    vmem_bytes = (2 * tb * tk * itemsize + 2 * w_block_bytes
                  + 2 * tb * n_pad * 4 + 2 * n_pad * 4)
    vmem_limit = int(min(max(vmem_bytes + (4 << 20), 32 << 20), 100 << 20))

    w_reads = 1 if w_resident else grid_b
    cost = pl.CostEstimate(
        flops=2 * grid_b * tb * ft_in * n_pad,
        transcendentals=0,
        bytes_accessed=(grid_b * tb * ft_in * itemsize
                        + w_reads * w_bytes
                        + n_pad * 4
                        + grid_b * tb * n_pad * 4),
    )

    kernel = functools.partial(
        logreg_kernel, num_k=num_k, tk=tk, w_resident=w_resident
    )

    out_full = pl.pallas_call(
        kernel,
        out_shape=jax.ShapeDtypeStruct((grid_b * tb, n_pad), jnp.float32),
        grid_spec=pltpu.PrefetchScalarGridSpec(
            num_scalar_prefetch=0,
            grid=(grid_b, num_k),
            in_specs=[
                pl.BlockSpec((tb, tk), lambda i, k: (i, k)),    # x: streamed tiles
                w_spec,                                         # W: resident / K-streamed
                pl.BlockSpec((1, n_pad), lambda i, k: (0, 0)),  # bias: fetched once
            ],
            out_specs=pl.BlockSpec((tb, n_pad), lambda i, k: (i, 0)),
        ),
        compiler_params=pltpu.CompilerParams(
            dimension_semantics=("parallel", "arbitrary"),
            vmem_limit_bytes=vmem_limit,
        ),
        cost_estimate=cost,
    )(seq, w_t, b2)

    # TODO(synk): downstream consumers can take the lane-padded logits directly (or
    # fuse softmax/argmax into the kernel) to avoid this slice copy.
    return out_full[:B, :nb_classes]


if __name__ == "__main__":
    key = jax.random.PRNGKey(0)
    k_w, k_x, k_w2, k_x2 = jax.random.split(key, 4)

    # --- small shape consistent with the module (single batch tile, single K step) ---
    B, ft_in, nb_classes = 8, 32, 8
    weight, bias = init_logreg_params(k_w, ft_in, nb_classes)
    w_t, b2 = prepare_logreg_params(weight, bias)   # hoisted transpose + lane padding
    seq = jax.random.normal(k_x, (B, ft_in), dtype=jnp.float32)

    out = jax.block_until_ready(logreg_forward(seq, w_t, b2, nb_classes))
    ref = jnp.matmul(seq, weight.T, precision=jax.lax.Precision.HIGHEST) + bias
    assert out.shape == (B, nb_classes)
    assert jnp.allclose(out, ref, atol=1e-5, rtol=1e-5)

    # --- also exercise the multi-batch-tile / K-tiled, resident-W accumulation path ---
    B2, ft2, nc2 = 24, 512, 10
    weight2, bias2 = init_logreg_params(k_w2, ft2, nc2)
    w_t2, b22 = prepare_logreg_params(weight2, bias2)
    seq2 = jax.random.normal(k_x2, (B2, ft2), dtype=jnp.float32)

    out2 = jax.block_until_ready(
        logreg_forward(seq2, w_t2, b22, nc2, tb_target=16, tk_target=128)
    )
    ref2 = jnp.matmul(seq2, weight2.T, precision=jax.lax.Precision.HIGHEST) + bias2
    assert out2.shape == (B2, nc2)
    assert jnp.allclose(out2, ref2, atol=1e-4, rtol=1e-4)

    print("KERNEL_OK")
</pallas_src>

<mosaic_0001>
module attributes {stable_mosaic.version = 11 : i64} {
  func.func @logreg_kernel(%arg0: i32, %arg1: i32, %arg2: memref<8x32xf32, #tpu.memory_space<vmem>>, %arg3: memref<32x128xf32, #tpu.memory_space<vmem>>, %arg4: memref<1x128xf32, #tpu.memory_space<vmem>>, %arg5: memref<8x128xf32, #tpu.memory_space<vmem>>) attributes {dimension_semantics = [#tpu.dimension_semantics<parallel>, #tpu.dimension_semantics<arbitrary>], iteration_bounds = array<i64: 1, 1>, scalar_prefetch = 0 : i64, scratch_operands = 0 : i64, tpu.core_type = #tpu.core_type<tc>, window_params = [{transform_indices = @transform_0, window_bounds = array<i64: 8, 32>}, {pipeline_mode = #tpu.pipeline_mode<synchronous>, transform_indices = @transform_1, window_bounds = array<i64: 32, 128>}, {pipeline_mode = #tpu.pipeline_mode<synchronous>, transform_indices = @transform_2, window_bounds = array<i64: 1, 128>}, {transform_indices = @transform_3, window_bounds = array<i64: 8, 128>}]} {
    %c0 = arith.constant 0 : index
    %c0_0 = arith.constant 0 : index
    %0 = vector.load %arg2[%c0, %c0_0] : memref<8x32xf32, #tpu.memory_space<vmem>>, vector<8x32xf32>
    %c0_1 = arith.constant 0 : index
    %c0_2 = arith.constant 0 : index
    %1 = vector.load %arg3[%c0_1, %c0_2] : memref<32x128xf32, #tpu.memory_space<vmem>>, vector<32x128xf32>
    %cst = arith.constant dense<0.000000e+00> : vector<8x128xf32>
    %2 = tpu.matmul %0, %1, %cst {dimension_numbers = #tpu.dot_dimension_numbers<[1], [0], [0], [1], [0, 0, 1, 1], [], []>} : vector<8x32xf32>, vector<32x128xf32>, vector<8x128xf32> -> vector<8x128xf32>
    %c0_3 = arith.constant 0 : index
    %c0_4 = arith.constant 0 : index
    %3 = vector.load %arg4[%c0_3, %c0_4] : memref<1x128xf32, #tpu.memory_space<vmem>>, vector<1x128xf32>
    %4 = vector.broadcast %3 : vector<1x128xf32> to vector<8x128xf32>
    %5 = arith.addf %2, %4 : vector<8x128xf32>
    %c0_5 = arith.constant 0 : index
    %c0_6 = arith.constant 0 : index
    %6 = vector.load %arg5[%c0_5, %c0_6] : memref<8x128xf32, #tpu.memory_space<vmem>>, vector<8x128xf32>
    tpu.vector_store %arg5[%c0_5, %c0_6], %5 {strides = array<i32>} : memref<8x128xf32, #tpu.memory_space<vmem>>, vector<8x128xf32>,
    return
  }
  func.func @transform_0(%arg0: i32, %arg1: i32) -> (i32, i32) {
    %c0_i32 = arith.constant 0 : i32
    return %arg0, %arg1 : i32, i32
  }
  func.func @transform_1(%arg0: i32, %arg1: i32) -> (i32, i32) {
    %c0_i32 = arith.constant 0 : i32
    %c0_i32_0 = arith.constant 0 : i32
    %c0_i32_1 = arith.constant 0 : i32
    return %c0_i32, %c0_i32_0 : i32, i32
  }
  func.func @transform_2(%arg0: i32, %arg1: i32) -> (i32, i32) {
    %c0_i32 = arith.constant 0 : i32
    %c0_i32_0 = arith.constant 0 : i32
    %c0_i32_1 = arith.constant 0 : i32
    return %c0_i32, %c0_i32_0 : i32, i32
  }
  func.func @transform_3(%arg0: i32, %arg1: i32) -> (i32, i32) {
    %c0_i32 = arith.constant 0 : i32
    %c0_i32_0 = arith.constant 0 : i32
    return %arg0, %c0_i32 : i32, i32
  }
}

</mosaic_0001>

<bundles_post_ra>
// kernel: logreg_forward.1
= control target key start
LH: loop header
LB: loop body
LE: loop exit
PB: predicated region body
PF: predicated region fallthrough
CT: control target
= control target key end

     0   :  { %8 = vsyncpa [#allocation3], 0  ;;  %s274_s0 = inlined_call_operand.hbm [shape: f32[8,32], index: 0, kind: input, shape index: {}]   ;;  %s275_s1 = inlined_call_operand.hbm [shape: f32[32,128], index: 1, kind: input, shape index: {}]   ;;  %s276_s2 = inlined_call_operand.vmem [shape: f32[1,128], index: 2, kind: input, shape index: {}]   ;;  %s277_s3 = inlined_call_operand.hbm [shape: f32[8,128], index: 3, kind: output, shape index: {}]  }
   0x1   :  { %9 = vsyncpa [#allocation6], 0 }
   0x2   :  { %10 = vsyncpa [#allocation4], 0  ;;  %s235_s12 = smov [#allocation2]   ;;  %s236_s14 = smov [#allocation5]  }
   0x3   :  { %s17_s13 = sshll.u32 %s235_s12, 4  ;;  %s26_s15 = sshll.u32 %s236_s14, 4  ;;  %s18_s13 = int_to_ptr.vmem [resolvable:$true] %s17_s13  ;;  %s27_s15 = int_to_ptr.vmem [resolvable:$true] %s26_s15 }
   0x4   :  { %s177_s16 = scalar_lea.vmem %s18_s13, 128  ;;  %p182_p1 = scmp.lt.s32.totalorder %s18_s13, %s18_s13 }
   0x5   :  { %p178_p0 = scmp.ne.s32.totalorder %s18_s13, %s177_s16  ;;  %p183_p2 = scmp.lt.s32.totalorder %s177_s16, %s177_s16 }
   0x7   :  { %p184_p3 = por %p183_p2, %p182_p1 }
   0x9   :  { %p185_p4 = pnand %p184_p3, %p178_p0 }
   0xb   :  { %188 = shalt.err (!%p185_p4)
}
   0xc   :  { %20 = dma.hbm_to_vmem [thread:$0]  %s274_s0, 128, %s18_s13, [#allocation3]  }
   0xd   :  { %s197_s19 = scalar_lea.vmem %s27_s15, 512  ;;  %p202_p6 = scmp.lt.s32.totalorder %s27_s15, %s27_s15 }
   0xe   :  { %p198_p5 = scmp.ne.s32.totalorder %s27_s15, %s197_s19  ;;  %p203_p7 = scmp.lt.s32.totalorder %s197_s19, %s197_s19 }
  0x10   :  { %p204_p8 = por %p203_p7, %p202_p6 }
  0x12   :  { %p205_p9 = pnand %p204_p8, %p198_p5 }
  0x14   :  { %208 = shalt.err (!%p205_p9)
}
  0x15   :  { %s237_s20 = smov 128   ;;  %s238_s21 = smov 8  }
  0x16   :  { %32 = dma.hbm_to_vmem [thread:$0]  %s275_s1, 512, %s27_s15, [#allocation6], %s237_s20, %s237_s20, %s238_s21  }
  0x17   :  { %229 = dma.done.wait [#allocation3], 128  }
  0x18   :  { %230 = vsyncadd [#allocation3], 4294967168 }
  0x19   :  { %231 = dma.done.wait [#allocation6], 512  }
  0x1a   :  { %232 = vsyncadd [#allocation6], 4294966784  ;;  %v239_v0 = vmov 0.0   ;;  %vm240_vm0 = vmmov 0   ;;  %v45_v1 = vld [vmem:[#allocation5 + $0x18] sm:$0xff]  ;;  %v44_v2 = vld [vmem:[#allocation5 + $0x10] sm:$0xff] }
  0x1b   :  { %151 = vmatprep.subr.mxu0 %v239_v0  ;;  %159 = vmatprep.mubr.msk.f32.mxu0 %vm240_vm0, %v239_v0  ;;  %v43_v3 = vld [vmem:[#allocation5 + $0x8] sm:$0xff]  ;;  %v42_v4 = vld [vmem:[#allocation5] sm:$0xff]  ;;  %v41_v5 = vld [vmem:[#allocation2] sm:$0xff]  ;;  %vm53_vm1 = vcmask 261120   ;;  %s241_s24 = smov [#allocation7]  }
  0x1c   :  { %152 = vmatpush3.msra.mxu0 %v45_v1  ;;  %v144_v6 = vld [vmem:[%s276_s2] ss:$0 sm:$0xff]  ;;  %s134_s25 = sshll.u32 %s241_s24, 4  ;;  %s135_s25 = int_to_ptr.vmem [resolvable:$true] %s134_s25 }
  0x1d   :  { %153 = vmatprep.subr.mxu0 %v239_v0  ;;  %s209_s26 = scalar_lea.vmem %s135_s25, 128  ;;  %p214_p11 = scmp.lt.s32.totalorder %s135_s25, %s135_s25 }
  0x1e   :  { %154 = vmatpush3.msra.mxu0 %v44_v2  ;;  %p210_p10 = scmp.ne.s32.totalorder %s135_s25, %s209_s26  ;;  %p215_p12 = scmp.lt.s32.totalorder %s209_s26, %s209_s26 }
  0x1f   :  { %155 = vmatprep.subr.mxu0 %v239_v0 }
  0x20   :  { %156 = vmatpush3.msra.mxu0 %v43_v3  ;;  %p216_p13 = por %p215_p12, %p214_p11 }
  0x21   :  { %157 = vmatprep.subr.mxu0 %v239_v0 }
  0x22   :  { %158 = vmatpush3.msra.mxu0 %v42_v4  ;;  %p217_p0 = pnand %p216_p13, %p210_p10 }
  0x23   :  { %160 = vmatmul.mubr.msk.f32.vlgmr.msra.gmra.mxu0 %vm53_vm1, %v41_v5 }
  0xe3   :  { %v123_v7 = vpop.f32.mrf.mxu0 }
  0xe4   :  { %v124_v8 = vadd.f32 %v144_v6, %v123_v7 }
  0xe5   :  { %v161_v9 = vpop.f32.mrf.mxu0 }
  0xe6   :  { %127 = vst [vmem:[#allocation7] sm:$0xff] %v124_v8 }
  0xe7   :  { %220 = shalt.err (!%p217_p0)
}
  0xe8   :  { %137 = dma.vmem_to_hbm [thread:$0]  %s135_s25, 128, %s277_s3, [#allocation4]  }
  0xe9   :  { %233 = dma.done.wait [#allocation4], 128  }
  0xea   :  { %234 = vsyncadd [#allocation4], 4294967168 }
  0xeb   :  { %141 = vsyncpa [#allocation3], 1 }
  0xec   :  { %142 = vsyncpa [#allocation6], 1 }
  0xed   :  { %143 = vsyncpa [#allocation4], 1 }

</bundles_post_ra>
